<compile_context>
chip_gen: v7x
topology: tpu7x:2x2x1
jax: 0.10.0
libtpu: 0.0.40
codegen_flags: <defaults>
</compile_context>

<pallas_src>
import functools
import math

import jax
import jax.numpy as jnp
from jax import lax
from jax.experimental import pallas as pl
from jax.experimental.pallas import tpu as pltpu

SAFE_V = 0.999999            # clamp used by the torch module
COS_EPS = 1e-8               # eps used by F.cosine_similarity
_DEG = 180.0 / math.pi

_LANE = 128
_MAX_LANES = 65536                       # sanity cap on the lane tile
_TARGET_STEP_READ = 4 * 1024 * 1024      # aim for ~4 MiB of input per grid step

# Abramowitz & Stegun 4.4.46: acos(x) ~ sqrt(1 - x) * poly(x) on [0, 1],
# |err| <= 2e-8 rad; reflected via acos(x) = pi - acos(-x) for x < 0.
_ACOS_COEFFS = (1.5707963050, -0.2145988016, 0.0889789874, -0.0501743046,
                0.0308918810, -0.0170881256, 0.0066700901, -0.0012624911)


def _acos(x):
    """Polynomial arccos for x in [-1, 1] (f32, VPU/EUP only)."""
    ax = jnp.abs(x)
    poly = jnp.float32(_ACOS_COEFFS[-1])
    for c in reversed(_ACOS_COEFFS[:-1]):
        poly = poly * ax + jnp.float32(c)
    r = jnp.sqrt(jnp.maximum(1.0 - ax, 0.0)) * poly
    return jnp.where(x < 0.0, jnp.float32(math.pi) - r, r)


def _angle_sum_kernel(p_ref, l_ref, o_ref, *, n_total, hw_total):
    """Partial sum of the angular error (degrees) for one grid step.

    p_ref / l_ref: (nb, C, tile) blocks in the *native* input dtype.
    o_ref:         (8, 128) block; the step's partial sum splatted into it.
    """
    nb, _, tile = p_ref.shape
    row_block = pl.program_id(0)
    col_block = pl.program_id(1)
    need_row_mask = (n_total % nb) != 0      # static
    need_col_mask = (hw_total % tile) != 0   # static

    def body(n, acc):
        # One batch row at a time: channel reductions are plain rank-2
        # sublane reduces; the block itself is still DMA'd as one big tile.
        p = p_ref[n].astype(jnp.float32)                       # (C, tile)
        l = l_ref[n].astype(jnp.float32)
        dot = jnp.sum(p * l, axis=0, keepdims=True)            # (1, tile)
        p2 = jnp.sum(p * p, axis=0, keepdims=True)
        l2 = jnp.sum(l * l, axis=0, keepdims=True)
        # F.cosine_similarity eps:  dot / max(||p||*||l||, eps)  via EUP rsqrt.
        inv = lax.rsqrt(jnp.maximum(p2 * l2, jnp.float32(COS_EPS * COS_EPS)))
        cos = jnp.clip(dot * inv, -SAFE_V, SAFE_V)
        ang = _acos(cos) * jnp.float32(_DEG)                   # (1, tile)
        if need_row_mask:
            # Ragged batch block: rows past N hold garbage -> select them away
            # (jnp.where fully selects, so NaNs cannot leak).
            rid = jnp.full((1, tile), row_block * nb + n, dtype=jnp.int32)
            ang = jnp.where(rid < n_total, ang, 0.0)
        return acc + ang

    acc = lax.fori_loop(0, nb, body, jnp.zeros((1, tile), jnp.float32),
                        unroll=nb <= 8)

    if need_col_mask:
        # Ragged spatial block: lanes past H*W hold garbage -> zero them out.
        col = lax.broadcasted_iota(jnp.int32, (1, tile), 1)
        acc = jnp.where(col_block * tile + col < hw_total, acc, 0.0)

    total = jnp.sum(acc, axis=1, keepdims=True)                # (1, 1)
    o_ref[...] = jnp.broadcast_to(total, o_ref.shape)


def _round_up(x, m):
    return -(-x // m) * m


@functools.lru_cache(maxsize=None)
def _vmem_limits():
    """(picker working-set budget, vmem_limit_bytes), generation aware."""
    phys = 64 * 1024 * 1024                        # conservative default (v7x-sized)
    try:
        cap = getattr(pltpu.get_tpu_info(), "vmem_capacity_bytes", None)
        if cap:
            phys = int(cap)
    except Exception:
        pass
    vmem_limit = min(3 * phys // 4, 96 * 1024 * 1024)   # v7x ~48 MiB, v5e/v6e ~96 MiB
    return vmem_limit // 2, vmem_limit


def _plan_blocking(N, C, HW, in_dtype, budget):
    """Pick (lane tile, batch rows per step, #lane tiles) for the grid."""
    itemsize = int(jnp.dtype(in_dtype).itemsize)
    c_in = _round_up(C, max(8, 32 // itemsize))      # sublane-padded C, input dtype
    c_f32 = _round_up(C, 8)                          # sublane-padded C, f32 temps
    in_bytes_per_row_lane = 4 * c_in * itemsize      # 2 inputs x 2 pipeline buffers
    temp_bytes_per_lane = 2 * c_f32 * 4 + 12 * 4     # per-row f32 upcasts + row temps

    if HW <= _LANE:
        tile = HW                                    # full extent -> layout-legal
    else:
        cap = min((HW // _LANE) * _LANE, _MAX_LANES)
        fit = budget // (in_bytes_per_row_lane + temp_bytes_per_lane)
        fit = max(_LANE, fit // _LANE * _LANE)
        tile = min(cap, fit)
    num_tiles = pl.cdiv(HW, tile)

    nb = 1
    step_read = 2 * C * itemsize * tile              # HBM bytes per step per row
    if N > 1 and step_read < _TARGET_STEP_READ:
        nb_fit = (budget - temp_bytes_per_lane * tile) // (in_bytes_per_row_lane * tile)
        nb = min(N, max(1, nb_fit),
                 max(1, _TARGET_STEP_READ // max(step_read, 1)))
        if num_tiles == 1:
            # Keep >= 2 grid steps so both TensorCores on v7x get work.
            nb = min(nb, max(1, (N + 1) // 2))
    return tile, nb, num_tiles


def _angular_partial_sums(pred, label):
    N, C, H, W = pred.shape
    HW = H * W

    # NCHW -> (N, C, H*W): contiguous reshape only (no transpose / pad / cast).
    p3 = pred.reshape(N, C, HW)
    l3 = label.reshape(N, C, HW)

    budget, vmem_limit = _vmem_limits()
    tile, nb, num_tiles = _plan_blocking(N, C, HW, p3.dtype, budget)
    n_blocks = pl.cdiv(N, nb)

    kernel = functools.partial(_angle_sum_kernel, n_total=N, hw_total=HW)
    out = pl.pallas_call(
        kernel,
        out_shape=jax.ShapeDtypeStruct((n_blocks, num_tiles, 8, _LANE), jnp.float32),
        grid=(n_blocks, num_tiles),
        in_specs=[
            pl.BlockSpec((nb, C, tile), lambda b, i: (b, 0, i)),
            pl.BlockSpec((nb, C, tile), lambda b, i: (b, 0, i)),
        ],
        out_specs=pl.BlockSpec((None, None, 8, _LANE), lambda b, i: (b, i, 0, 0)),
        compiler_params=pltpu.CompilerParams(
            dimension_semantics=("parallel", "parallel"),
            vmem_limit_bytes=vmem_limit,
        ),
    )(p3, l3)
    return out[:, :, 0, 0], N * HW


@jax.jit
def angular_loss(pred, label):
    """Matches Angular_loss._compute_angular_loss(pred, label)."""
    partial_sums, count = _angular_partial_sums(pred, label)
    # TODO(synk): the final tiny (n_blocks x num_tiles) sum + divide stays in
    # JAX glue; all element/row work (incl. acos) is fused inside the kernel.
    return jnp.sum(partial_sums) / jnp.float32(count)


def angular_loss_forward(pred_dict, gt_dict):
    """Mirrors Angular_loss.forward(pred_dict, gt_dict)."""
    return angular_loss(pred_dict["y_hat"], gt_dict["y"])


def _angular_loss_ref(pred, label):
    """Pure-JAX reference mirroring the torch module (exact jnp.arccos)."""
    pred = pred.astype(jnp.float32)
    label = label.astype(jnp.float32)
    dot = jnp.sum(pred * label, axis=1)
    norms = (jnp.sqrt(jnp.sum(pred * pred, axis=1))
             * jnp.sqrt(jnp.sum(label * label, axis=1)))
    cos = jnp.clip(dot / jnp.maximum(norms, COS_EPS), -SAFE_V, SAFE_V)
    return jnp.mean(jnp.arccos(cos) * _DEG)


if __name__ == "__main__":
    key = jax.random.PRNGKey(0)
    k1, k2, k3, k4 = jax.random.split(key, 4)

    # Small NCHW shapes consistent with the module's dim=1 cosine similarity.
    pred = jax.random.normal(k1, (2, 4, 16, 16), dtype=jnp.float32)
    label = jax.random.normal(k2, (2, 4, 16, 16), dtype=jnp.float32)

    loss = jax.block_until_ready(angular_loss_forward({"y_hat": pred}, {"y": label}))
    assert loss.shape == () and loss.dtype == jnp.float32
    ref = _angular_loss_ref(pred, label)
    assert jnp.allclose(loss, ref, rtol=1e-3, atol=1e-2), (loss, ref)

    # Ragged spatial extent + bf16 inputs: exercises the in-kernel edge masking
    # (no host-side pad) and the in-VMEM upcast path.
    pred2 = jax.random.normal(k3, (5, 3, 9, 17), dtype=jnp.bfloat16)
    label2 = jax.random.normal(k4, (5, 3, 9, 17), dtype=jnp.bfloat16)
    loss2 = jax.block_until_ready(angular_loss(pred2, label2))
    ref2 = _angular_loss_ref(pred2, label2)
    assert jnp.allclose(loss2, ref2, rtol=1e-3, atol=5e-2), (loss2, ref2)

    print("KERNEL_OK")
</pallas_src>

<mosaic_0001>
module attributes {stable_mosaic.version = 11 : i64} {
  func.func @_angle_sum_kernel(%arg0: i32, %arg1: i32, %arg2: memref<1x4x256xf32, #tpu.memory_space<vmem>>, %arg3: memref<1x4x256xf32, #tpu.memory_space<vmem>>, %arg4: memref<1x1x8x128xf32, #tpu.memory_space<vmem>>) attributes {dimension_semantics = [#tpu.dimension_semantics<parallel>, #tpu.dimension_semantics<parallel>], iteration_bounds = array<i64: 2, 1>, scalar_prefetch = 0 : i64, scratch_operands = 0 : i64, tpu.core_type = #tpu.core_type<tc>, window_params = [{transform_indices = @transform_0, window_bounds = array<i64: 1, 4, 256>}, {transform_indices = @transform_1, window_bounds = array<i64: 1, 4, 256>}, {transform_indices = @transform_2, window_bounds = array<i64: 1, 1, 8, 128>}]} {
    %cst = arith.constant 0.000000e+00 : f32
    %0 = vector.broadcast %cst : f32 to vector<1x256xf32>
    %c0_i32 = arith.constant 0 : i32
    %1 = arith.index_cast %c0_i32 : i32 to index
    %c0 = arith.constant 0 : index
    %c0_0 = arith.constant 0 : index
    %2 = vector.load %arg2[%1, %c0, %c0_0] : memref<1x4x256xf32, #tpu.memory_space<vmem>>, vector<1x4x256xf32>
    %3 = vector.shape_cast %2 : vector<1x4x256xf32> to vector<4x256xf32>
    %4 = arith.index_cast %c0_i32 : i32 to index
    %c0_1 = arith.constant 0 : index
    %c0_2 = arith.constant 0 : index
    %5 = vector.load %arg3[%4, %c0_1, %c0_2] : memref<1x4x256xf32, #tpu.memory_space<vmem>>, vector<1x4x256xf32>
    %6 = vector.shape_cast %5 : vector<1x4x256xf32> to vector<4x256xf32>
    %7 = arith.mulf %3, %6 : vector<4x256xf32>
    %cst_3 = arith.constant dense<0.000000e+00> : vector<256xf32>
    %8 = vector.multi_reduction <add>, %7, %cst_3 [0] : vector<4x256xf32> to vector<256xf32>
    %9 = vector.shape_cast %8 : vector<256xf32> to vector<1x256xf32>
    %10 = arith.mulf %3, %3 : vector<4x256xf32>
    %cst_4 = arith.constant dense<0.000000e+00> : vector<256xf32>
    %11 = vector.multi_reduction <add>, %10, %cst_4 [0] : vector<4x256xf32> to vector<256xf32>
    %12 = vector.shape_cast %11 : vector<256xf32> to vector<1x256xf32>
    %13 = arith.mulf %6, %6 : vector<4x256xf32>
    %cst_5 = arith.constant dense<0.000000e+00> : vector<256xf32>
    %14 = vector.multi_reduction <add>, %13, %cst_5 [0] : vector<4x256xf32> to vector<256xf32>
    %15 = vector.shape_cast %14 : vector<256xf32> to vector<1x256xf32>
    %16 = arith.mulf %12, %15 : vector<1x256xf32>
    %cst_6 = arith.constant 1.000000e-16 : f32
    %17 = vector.broadcast %cst_6 : f32 to vector<1x256xf32>
    %18 = arith.maximumf %16, %17 : vector<1x256xf32>
    %19 = math.rsqrt %18 : vector<1x256xf32>
    %20 = arith.mulf %9, %19 : vector<1x256xf32>
    %cst_7 = arith.constant -0.999998986 : f32
    %cst_8 = arith.constant 0.999998986 : f32
    %21 = vector.broadcast %cst_7 : f32 to vector<1x256xf32>
    %22 = arith.maximumf %21, %20 : vector<1x256xf32>
    %23 = vector.broadcast %cst_8 : f32 to vector<1x256xf32>
    %24 = arith.minimumf %23, %22 : vector<1x256xf32>
    %25 = math.absf %24 : vector<1x256xf32>
    %cst_9 = arith.constant -0.0012624911 : f32
    %26 = vector.broadcast %cst_9 : f32 to vector<1x256xf32>
    %27 = arith.mulf %26, %25 : vector<1x256xf32>
    %cst_10 = arith.constant 6.670090e-03 : f32
    %28 = vector.broadcast %cst_10 : f32 to vector<1x256xf32>
    %29 = arith.addf %27, %28 : vector<1x256xf32>
    %30 = arith.mulf %29, %25 : vector<1x256xf32>
    %cst_11 = arith.constant -0.0170881264 : f32
    %31 = vector.broadcast %cst_11 : f32 to vector<1x256xf32>
    %32 = arith.addf %30, %31 : vector<1x256xf32>
    %33 = arith.mulf %32, %25 : vector<1x256xf32>
    %cst_12 = arith.constant 0.0308918804 : f32
    %34 = vector.broadcast %cst_12 : f32 to vector<1x256xf32>
    %35 = arith.addf %33, %34 : vector<1x256xf32>
    %36 = arith.mulf %35, %25 : vector<1x256xf32>
    %cst_13 = arith.constant -0.0501743034 : f32
    %37 = vector.broadcast %cst_13 : f32 to vector<1x256xf32>
    %38 = arith.addf %36, %37 : vector<1x256xf32>
    %39 = arith.mulf %38, %25 : vector<1x256xf32>
    %cst_14 = arith.constant 0.0889789909 : f32
    %40 = vector.broadcast %cst_14 : f32 to vector<1x256xf32>
    %41 = arith.addf %39, %40 : vector<1x256xf32>
    %42 = arith.mulf %41, %25 : vector<1x256xf32>
    %cst_15 = arith.constant -0.214598805 : f32
    %43 = vector.broadcast %cst_15 : f32 to vector<1x256xf32>
    %44 = arith.addf %42, %43 : vector<1x256xf32>
    %45 = arith.mulf %44, %25 : vector<1x256xf32>
    %cst_16 = arith.constant 1.57079625 : f32
    %46 = vector.broadcast %cst_16 : f32 to vector<1x256xf32>
    %47 = arith.addf %45, %46 : vector<1x256xf32>
    %cst_17 = arith.constant 1.000000e+00 : f32
    %48 = vector.broadcast %cst_17 : f32 to vector<1x256xf32>
    %49 = arith.subf %48, %25 : vector<1x256xf32>
    %cst_18 = arith.constant 0.000000e+00 : f32
    %50 = vector.broadcast %cst_18 : f32 to vector<1x256xf32>
    %51 = arith.maximumf %49, %50 : vector<1x256xf32>
    %52 = math.sqrt %51 : vector<1x256xf32>
    %53 = arith.mulf %52, %47 : vector<1x256xf32>
    %cst_19 = arith.constant 0.000000e+00 : f32
    %54 = vector.broadcast %cst_19 : f32 to vector<1x256xf32>
    %55 = arith.cmpf olt, %24, %54 : vector<1x256xf32>
    %cst_20 = arith.constant 3.14159274 : f32
    %56 = vector.broadcast %cst_20 : f32 to vector<1x256xf32>
    %57 = arith.subf %56, %53 : vector<1x256xf32>
    %58 = arith.select %55, %57, %53 : vector<1x256xi1>, vector<1x256xf32>
    %cst_21 = arith.constant 57.2957802 : f32
    %59 = vector.broadcast %cst_21 : f32 to vector<1x256xf32>
    %60 = arith.mulf %58, %59 : vector<1x256xf32>
    %61 = arith.addf %0, %60 : vector<1x256xf32>
    %c1_i32 = arith.constant 1 : i32
    %cst_22 = arith.constant dense<0.000000e+00> : vector<1xf32>
    %62 = vector.multi_reduction <add>, %61, %cst_22 [1] : vector<1x256xf32> to vector<1xf32>
    %63 = vector.shape_cast %62 : vector<1xf32> to vector<1x1xf32>
    %64 = vector.shape_cast %63 : vector<1x1xf32> to vector<1x1xf32>
    %65 = vector.broadcast %64 : vector<1x1xf32> to vector<8x128xf32>
    %c0_23 = arith.constant 0 : index
    %c0_24 = arith.constant 0 : index
    %c0_25 = arith.constant 0 : index
    %c0_26 = arith.constant 0 : index
    %66 = vector.load %arg4[%c0_23, %c0_24, %c0_25, %c0_26] : memref<1x1x8x128xf32, #tpu.memory_space<vmem>>, vector<1x1x8x128xf32>
    %67 = vector.shape_cast %66 : vector<1x1x8x128xf32> to vector<8x128xf32>
    %68 = vector.shape_cast %65 : vector<8x128xf32> to vector<1x1x8x128xf32>
    tpu.vector_store %arg4[%c0_23, %c0_24, %c0_25, %c0_26], %68 {strides = array<i32>} : memref<1x1x8x128xf32, #tpu.memory_space<vmem>>, vector<1x1x8x128xf32>,
    return
  }
  func.func @transform_0(%arg0: i32, %arg1: i32) -> (i32, i32, i32) {
    %c0_i32 = arith.constant 0 : i32
    %c0_i32_0 = arith.constant 0 : i32
    return %arg0, %c0_i32, %arg1 : i32, i32, i32
  }
  func.func @transform_1(%arg0: i32, %arg1: i32) -> (i32, i32, i32) {
    %c0_i32 = arith.constant 0 : i32
    %c0_i32_0 = arith.constant 0 : i32
    return %arg0, %c0_i32, %arg1 : i32, i32, i32
  }
  func.func @transform_2(%arg0: i32, %arg1: i32) -> (i32, i32, i32, i32) {
    %c0_i32 = arith.constant 0 : i32
    %c0_i32_0 = arith.constant 0 : i32
    %c0_i32_1 = arith.constant 0 : i32
    return %arg0, %arg1, %c0_i32, %c0_i32_0 : i32, i32, i32, i32
  }
}

</mosaic_0001>

<bundles_post_ra>
// kernel: angular_loss.1
= control target key start
LH: loop header
LB: loop body
LE: loop exit
PB: predicated region body
PF: predicated region fallthrough
CT: control target
= control target key end

     0   :  { %s529_s9 = smov 0   ;;  %s531_s10 = smov 0   ;;  %s576_s0 = inlined_call_operand.vmem [shape: f32[2,4,256], index: 0, kind: input, shape index: {}]   ;;  %s577_s1 = inlined_call_operand.vmem [shape: f32[2,4,256], index: 1, kind: input, shape index: {}]   ;;  %s578_s2 = inlined_call_operand.vmem [shape: f32[2,1,8,128], index: 2, kind: output, shape index: {}]  }
   0x1   :  { %s533_s11 = smov 0  }
   0x2 LB: > { %s24_s12 = sadd.s32 1, %s508_s10  ;;  %p446_p0 = scmp.ge.s32.totalorder %s512_s11, 1  ;;  %s512_s11 = sphi %s533_s11, %s12_s11   ;;  %s508_s10 = sphi %s531_s10, %s580_s10   ;;  %s504_s9 = sphi %s529_s9, %s579_s9  }
   0x3   : > { %p26_p1 = scmp.ge.s32.totalorder %s24_s12, 2  ;;  %p150_p2 = scmp.lt.s32.totalorder %s512_s11, 3 }
   0x5   : > { %s582_s12 = smov (%p26_p1, %s24_s12), 0  ;;  %p151_p3 = pnand %p446_p0, %p150_p2 }
   0x6   : > { %p188_p4 = scmp.lt.s32.totalorder (!%p151_p3), %s504_s9, 1  ;;  %vm220_vm0 = vcmask (!%p151_p3), 1043456  }
   0x7   : > { %154 = sbr.rel (%p151_p3) target bundleno = 237 (0xed), region = 28 }
   0xe   : > { %s584_s9 = smov (!%p188_p4, %s504_s9), 1 }
   0xf   : > { %s547_s13 = sshll.u32 %s584_s9, 3 }
  0x10   : > { %s195_s16 = scalar_lea.vmem %s576_s0, %s547_s13  ;;  %s205_s19 = scalar_lea.vmem %s577_s1, %s547_s13 }
  0x11   : > { %v214_v0 = vld [vmem:[%s195_s16] sm:$0xff]  ;;  %s213_s22 = scalar_lea.vmem %s578_s2, %s547_s13 }
  0x12   : > { %v215_v1 = vld [vmem:[%s205_s19] sm:$0xff]  ;;  %v235_v3 = vmul.f32 %v214_v0, %v214_v0 }
  0x13   : > { %v216_v2 = vmul.f32 %v215_v1, %v214_v0  ;;  %v253_v4 = vmul.f32 %v215_v1, %v215_v1 }
  0x14   : > { %v237_v5 = vcombine.high %v235_v3, %v235_v3  ;;  %v239_v6 = vsel %vm220_vm0, %v235_v3, 0.0 }
  0x15   : > { %v240_v7 = vrot.slane %v239_v6, 4  ;;  %v255_v8 = vcombine.high %v253_v4, %v253_v4  ;;  %v257_v9 = vsel %vm220_vm0, %v253_v4, 0.0  ;;  %v218_v10 = vcombine.high %v216_v2, %v216_v2 }
  0x16   : > { %v221_v11 = vsel %vm220_vm0, %v216_v2, 0.0  ;;  %v246_v12 = vsel %vm220_vm0, %v237_v5, 0.0  ;;  %v258_v13 = vrot.slane %v257_v9, 4 }
  0x17   : > { %v241_v14 = vadd.f32 %v240_v7, %v239_v6  ;;  %v247_v15 = vrot.slane %v246_v12, 4  ;;  %v264_v17 = vsel %vm220_vm0, %v255_v8, 0.0  ;;  %v222_v18 = vrot.slane %v221_v11, 4 }
  0x18   : > { %v259_v16 = vadd.f32 %v258_v13, %v257_v9  ;;  %v228_v21 = vsel %vm220_vm0, %v218_v10, 0.0  ;;  %v265_v23 = vrot.slane %v264_v17, 4 }
  0x19   : > { %v242_v19 = vrot.slane %v241_v14, 2  ;;  %v248_v20 = vadd.f32 %v247_v15, %v246_v12  ;;  %v223_v28 = vadd.f32 %v222_v18, %v221_v11  ;;  %v229_v29 = vrot.slane %v228_v21, 4 }
  0x1a   : > { %v260_v22 = vrot.slane %v259_v16, 2  ;;  %v266_v27 = vadd.f32 %v265_v23, %v264_v17 }
  0x1b   : > { %v243_v24 = vadd.f32 %v242_v19, %v241_v14  ;;  %v249_v25 = vrot.slane %v248_v20, 2  ;;  %v224_v38 = vrot.slane %v223_v28, 2  ;;  %v230_v39 = vadd.f32 %v229_v29, %v228_v21 }
  0x1c   : > { %v261_v26 = vadd.f32 %v260_v22, %v259_v16  ;;  %v267_v33 = vrot.slane %v266_v27, 2 }
  0x1d   : > { %v244_v30 = vrot.slane %v243_v24, 1  ;;  %v250_v31 = vadd.f32 %v249_v25, %v248_v20  ;;  %v225_v45 = vadd.f32 %v224_v38, %v223_v28  ;;  %v231_v46 = vrot.slane %v230_v39, 2 }
  0x1e   : > { %v262_v32 = vrot.slane %v261_v26, 1  ;;  %v268_v37 = vadd.f32 %v267_v33, %v266_v27 }
  0x1f   : > { %v245_v34 = vadd.f32 %v244_v30, %v243_v24  ;;  %v251_v35 = vrot.slane %v250_v31, 1  ;;  %v226_v49 = vrot.slane %v225_v45, 1  ;;  %v232_v50 = vadd.f32 %v231_v46, %v230_v39 }
  0x20   : > { %v263_v36 = vadd.f32 %v262_v32, %v261_v26  ;;  %v269_v41 = vrot.slane %v268_v37, 1 }
  0x21   : > { %v252_v40 = vadd.f32 %v251_v35, %v250_v31  ;;  %v227_v51 = vadd.f32 %v226_v49, %v225_v45  ;;  %v233_v52 = vrot.slane %v232_v50, 1 }
  0x22   : > { %v271_v42 = vmul.f32 %v263_v36, %v245_v34  ;;  %v270_v43 = vadd.f32 %v269_v41, %v268_v37 }
  0x23   : > { %v234_v54 = vadd.f32 %v233_v52, %v232_v50 }
  0x24   : > { %v273_v44 = vmax.f32 %v271_v42, 1e-16  ;;  %v272_v47 = vmul.f32 %v270_v43, %v252_v40 }
  0x26   : > { %482 = vrsqrt.f32 %v273_v44  ;;  %v274_v48 = vmax.f32 %v272_v47, 1e-16 }
  0x28   : > { %484 = vrsqrt.f32 %v274_v48 }
  0x30   : > { %v483_v53 = vpop.eup %482 }
  0x31   : > { %v277_v55 = vmul.f32 %v483_v53, %v227_v51 }
  0x32   : > { %v485_v57 = vpop.eup %484 }
  0x33   : > { %v452_v56 = vclamps-f32 %v277_v55, 0.999999  ;;  %v278_v58 = vmul.f32 %v485_v57, %v234_v54 }
  0x35   : > { %v283_v59 = vand.u32 2147483647, %v452_v56  ;;  %v453_v60 = vclamps-f32 %v278_v58, 0.999999  ;;  %vm333_vm5 = vcmp.lt.f32.partialorder %v452_v56, 0.0 }
  0x37   : > { %v285_v61 = vmul.f32 -0.0012624911, %v283_v59  ;;  %v313_v62 = vsub.f32 1.0, %v283_v59  ;;  %v284_v63 = vand.u32 2147483647, %v453_v60  ;;  %vm334_vm6 = vcmp.lt.f32.partialorder %v453_v60, 0.0 }
  0x39   : > { %v287_v0 = vadd.f32 0.00667009, %v285_v61  ;;  %v315_v1 = vmax.f32 %v313_v62, 0.0  ;;  %v286_v2 = vmul.f32 -0.0012624911, %v284_v63  ;;  %v314_v4 = vsub.f32 1.0, %v284_v63 }
  0x3b   : > { %v289_v3 = vmul.f32 %v287_v0, %v283_v59  ;;  %486 = vrsqrt.f32 %v315_v1  ;;  %v288_v5 = vadd.f32 0.00667009, %v286_v2  ;;  %v316_v7 = vmax.f32 %v314_v4, 0.0 }
  0x3c   : > { %vm319_vm1 = vcmp.eq.f32.partialorder %v315_v1, inf  ;;  %vm321_vm2 = vcmp.eq.f32.partialorder %v315_v1, 0.0  ;;  %v322_v25 = vand.u32 2147483648, %v315_v1 }
  0x3d   : > { %v291_v6 = vadd.f32 -0.017088126, %v289_v3  ;;  %v290_v8 = vmul.f32 %v288_v5, %v284_v63  ;;  %488 = vrsqrt.f32 %v316_v7  ;;  %vm326_vm3 = vcmp.eq.f32.partialorder %v316_v7, inf }
  0x3e   : > { %v329_v33 = vand.u32 2147483648, %v316_v7  ;;  %vm328_vm4 = vcmp.eq.f32.partialorder %v316_v7, 0.0 }
  0x3f   : > { %v293_v9 = vmul.f32 %v291_v6, %v283_v59  ;;  %v292_v10 = vadd.f32 -0.017088126, %v290_v8 }
  0x41   : > { %v295_v11 = vadd.f32 0.03089188, %v293_v9  ;;  %v294_v12 = vmul.f32 %v292_v10, %v284_v63 }
  0x43   : > { %v297_v13 = vmul.f32 %v295_v11, %v283_v59  ;;  %v296_v14 = vadd.f32 0.03089188, %v294_v12 }
  0x45   : > { %v299_v15 = vadd.f32 -0.050174303, %v297_v13  ;;  %v487_v16 = vpop.eup %486  ;;  %v298_v17 = vmul.f32 %v296_v14, %v284_v63 }
  0x46   : > { %v318_v21 = vmul.f32 %v487_v16, %v315_v1 }
  0x47   : > { %v301_v18 = vmul.f32 %v299_v15, %v283_v59  ;;  %v300_v19 = vadd.f32 -0.050174303, %v298_v17  ;;  %v489_v22 = vpop.eup %488 }
  0x48   : > { %v320_v28 = vsel %vm319_vm1, %v315_v1, %v318_v21  ;;  %v325_v29 = vmul.f32 %v489_v22, %v316_v7 }
  0x49   : > { %v303_v20 = vadd.f32 0.08897899, %v301_v18  ;;  %v302_v23 = vmul.f32 %v300_v19, %v284_v63  ;;  %v323_v32 = vsel %vm321_vm2, %v322_v25, %v320_v28 }
  0x4a   : > { %v327_v36 = vsel %vm326_vm3, %v316_v7, %v325_v29 }
  0x4b   : > { %v305_v24 = vmul.f32 %v303_v20, %v283_v59  ;;  %v304_v26 = vadd.f32 0.08897899, %v302_v23  ;;  %v330_v39 = vsel %vm328_vm4, %v329_v33, %v327_v36 }
  0x4d   : > { %v307_v27 = vadd.f32 -0.2145988, %v305_v24  ;;  %v306_v30 = vmul.f32 %v304_v26, %v284_v63 }
  0x4f   : > { %v309_v31 = vmul.f32 %v307_v27, %v283_v59  ;;  %v308_v34 = vadd.f32 -0.2145988, %v306_v30 }
  0x51   : > { %v311_v35 = vadd.f32 1.5707963, %v309_v31  ;;  %v310_v37 = vmul.f32 %v308_v34, %v284_v63 }
  0x53   : > { %v331_v38 = vmul.f32 %v323_v32, %v311_v35  ;;  %v312_v40 = vadd.f32 1.5707963, %v310_v37 }
  0x55   : > { %v335_v41 = vsub.f32 3.1415927, %v331_v38  ;;  %v332_v42 = vmul.f32 %v330_v39, %v312_v40 }
  0x57   : > { %v337_v43 = vsel %vm333_vm5, %v335_v41, %v331_v38  ;;  %v336_v44 = vsub.f32 3.1415927, %v332_v42 }
  0x58   : > { %v339_v45 = vmul.f32 57.29578, %v337_v43 }
  0x59   : > { %v338_v46 = vsel %vm334_vm6, %v336_v44, %v332_v42 }
  0x5a   : > { %v340_v47 = vmul.f32 57.29578, %v338_v46 }
  0x5c   : > { %v343_v48 = vadd.f32 %v340_v47, %v339_v45 }
  0x5e   : > { %344 = vadd.xlane.f32.xlu0 %v343_v48 }
  0xeb   : > { %v345_v49 = vpop.xlane.xlu0 %344 }
  0xec   : > { %346 = vst [vmem:[%s213_s22] sm:$0xff] %v345_v49 }
  0xed PF: > { %s12_s11 = sadd.s32 1, %s512_s11   ;;  %s579_s9 = smov %s508_s10 }
  0xee   : > { %p9_p5 = scmp.ge.s32.totalorder %s12_s11, 4   ;;  %s580_s10 = smov %s582_s12 }
  0xf0   :  { %11 = sbr.rel (!%p9_p5) target bundleno = 2 (0x2), region = 61 }

</bundles_post_ra>
